<compile_context>
chip_gen: v5e
topology: v5e:2x2
jax: 0.10.0
libtpu: 0.0.40
codegen_flags: <defaults>
</compile_context>

<pallas_src>
import functools

import jax
import jax.numpy as jnp
from jax.experimental import pallas as pl
from jax.experimental.pallas import tpu as pltpu

_PAIRWISE_EPS = 1e-6  # torch.nn.functional.pairwise_distance default eps


def _pick_d_chunk(D):
    """Largest lane-aligned (multiple-of-128) chunk that divides D, to bound f32 temps."""
    if D <= 1024:
        return D
    for c in (1024, 896, 768, 640, 512, 384, 256, 128):
        if D % c == 0:
            return c
    return D  # no aligned divisor: full-width fallback (TB shrinks via the budget instead)


def _vmem_budget():
    """Returns (pipeline-buffer byte budget, vmem_limit_bytes), generation-aware."""
    budget, limit = 16 << 20, 40 << 20          # conservative default: fits v7x 64-MiB VMEM/TC
    try:
        info = pltpu.get_tpu_info()
        vmem = int(getattr(info, "vmem_capacity_bytes", 0) or 0)
        if vmem >= (128 << 20):                 # v5e / v6e: 128-MiB VMEM per TensorCore
            budget, limit = 32 << 20, 64 << 20
    except Exception:
        pass
    return budget, limit


def _contrastive_kernel(o1_ref, o2_ref, lbl_ref, out_ref, *,
                        margin, batch, tile_b, d_chunk, needs_mask):
    i = pl.program_id(0)
    D = o1_ref.shape[-1]
    n_chunks = D // d_chunk
    eps = jnp.float32(_PAIRWISE_EPS)

    if n_chunks <= 1:
        # Full-width path (small / modest D); f32 temporaries are accounted for in
        # the wrapper's per-row VMEM budget.
        diff = (o1_ref[...].astype(jnp.float32)
                - o2_ref[...].astype(jnp.float32) + eps)
        sq_dist = jnp.sum(diff * diff, axis=-1, keepdims=True)            # (TB, 1)
    else:
        # Chunked over D: bounds live f32 temporaries to ~3 * TB * d_chunk * 4 bytes
        # so TB can stay at the full DMA budget for any D.
        def body(c, acc):
            start = pl.multiple_of(c * d_chunk, d_chunk)
            a = o1_ref[:, pl.ds(start, d_chunk)].astype(jnp.float32)
            b = o2_ref[:, pl.ds(start, d_chunk)].astype(jnp.float32)
            d = a - b + eps
            return acc + jnp.sum(d * d, axis=-1, keepdims=True)

        sq_dist = jax.lax.fori_loop(
            0, n_chunks, body, jnp.zeros((tile_b, 1), jnp.float32),
            unroll=(n_chunks <= 8))

    # Per-row tail in lane-sparse (TB,1) layout.
    # TODO(synk): for small D, lane-densify sq_dist to (TB//128, 128) before the
    # sqrt/hinge (cuts EUP/VALU pushes ~128x) -- needs a bundle-dump check that the
    # relayout stays in the XLU and does not round-trip through VMEM.
    lbl = lbl_ref[...]                                                    # (TB, 1) f32
    dist = jnp.sqrt(sq_dist)
    hinge = jnp.maximum(jnp.float32(margin) - dist, 0.0)
    per_sample = lbl * sq_dist + (1.0 - lbl) * hinge * hinge              # (TB, 1)

    if needs_mask:
        last = pl.num_programs(0) - 1

        @pl.when(i == last)
        def _():
            # Only the remainder tile pays for the iota/compare/select; the select
            # also keeps NaN/Inf from padded-edge garbage out of the partial sum.
            row = i * tile_b + jax.lax.broadcasted_iota(jnp.int32, (tile_b, 1), 0)
            out_ref[0, 0] = jnp.sum(jnp.where(row < batch, per_sample, 0.0))

        @pl.when(i != last)
        def _():
            out_ref[0, 0] = jnp.sum(per_sample)
    else:
        out_ref[0, 0] = jnp.sum(per_sample)


def contrastive_loss(output1, output2, label, margin=1.0):
    """Pallas TPU implementation of ContrastiveLoss.forward.

    output1, output2: (B, D) float arrays (any float dtype; cast in-kernel)
    label:            (B,)   0/1 array
    returns: scalar float32 loss
    """
    B, D = output1.shape
    label2d = label.reshape(B, 1).astype(jnp.float32)

    it1 = jnp.dtype(output1.dtype).itemsize
    it2 = jnp.dtype(output2.dtype).itemsize

    budget_bytes, vmem_limit = _vmem_budget()
    d_chunk = _pick_d_chunk(D)

    # VMEM bytes needed per batch row:
    #   2 pipeline buffers per input (native dtype) + 2 label buffers (f32)
    #   + live in-kernel f32 temporaries (two casts + diff over one D chunk)
    #   + a handful of (TB,1) f32 columns (sq_dist / dist / hinge / per_sample / acc).
    per_row_bytes = 2 * D * (it1 + it2) + 2 * 4 + 3 * d_chunk * 4 + 8 * 4

    # Tile the batch as large as the budget allows (no artificial row cap: small-D
    # cases need multi-MiB tiles to amortize the ~0.35us per-grid-step overhead).
    tb = max(8, budget_bytes // per_row_bytes)
    if B >= 16:
        # Keep at least two tiles so the "parallel" axis can shard across both
        # TensorCores on v7x (neutral on single-TC v5e/v6e).
        tb = min(tb, ((pl.cdiv(B, 2) + 7) // 8) * 8)
    tb = min(tb, ((B + 7) // 8) * 8)    # don't tile past the (padded) batch
    tb = max(8, (tb // 8) * 8)          # sublane-aligned
    num_tiles = pl.cdiv(B, tb)
    needs_mask = (B % tb) != 0

    kernel = functools.partial(
        _contrastive_kernel, margin=float(margin), batch=B, tile_b=tb,
        d_chunk=d_chunk, needs_mask=needs_mask)

    # Only when per-step DMA is tiny (small tiles forced by odd shapes): deepen
    # input pipelining to hide DMA issue latency. MiB-scale tiles keep default 2.
    deep = (num_tiles >= 4) and (tb * D * max(it1, it2) <= (256 << 10))
    if deep:
        def big_spec():
            return pl.BlockSpec((tb, D), lambda i: (i, 0),
                                pipeline_mode=pl.Buffered(3))
    else:
        def big_spec():
            return pl.BlockSpec((tb, D), lambda i: (i, 0))

    bytes_accessed = B * D * (it1 + it2) + B * 4 + num_tiles * 4
    cost = pl.CostEstimate(flops=5 * B * D + 8 * B,
                           transcendentals=B,
                           bytes_accessed=bytes_accessed)

    partial = pl.pallas_call(
        kernel,
        out_shape=jax.ShapeDtypeStruct((num_tiles, 1), jnp.float32),
        grid=(num_tiles,),
        in_specs=[
            big_spec(),
            big_spec(),
            pl.BlockSpec((tb, 1), lambda i: (i, 0)),
        ],
        out_specs=pl.BlockSpec((1, 1), lambda i: (i, 0),
                               memory_space=pltpu.SMEM),
        compiler_params=pltpu.CompilerParams(
            dimension_semantics=("parallel",),
            vmem_limit_bytes=vmem_limit,
        ),
        cost_estimate=cost,
    )(output1, output2, label2d)

    # Final mean over the true batch size (cheap scalar reduce in the wrapper).
    return jnp.sum(partial) / jnp.float32(B)


def _reference(output1, output2, label, margin=1.0):
    # Pure-JAX reference mirroring the PyTorch module.
    diff = output1.astype(jnp.float32) - output2.astype(jnp.float32) + _PAIRWISE_EPS
    dist = jnp.sqrt(jnp.sum(diff * diff, axis=-1))
    loss = jnp.mean(label * dist**2
                    + (1.0 - label) * jnp.maximum(margin - dist, 0.0) ** 2)
    return loss


if __name__ == "__main__":
    key = jax.random.PRNGKey(0)
    k1, k2, k3, k4, k5, k6 = jax.random.split(key, 6)

    # Small canonical shapes.
    B, D = 8, 32
    output1 = jax.random.normal(k1, (B, D), dtype=jnp.float32)
    output2 = jax.random.normal(k2, (B, D), dtype=jnp.float32)
    label = jax.random.bernoulli(k3, p=0.5, shape=(B,)).astype(jnp.float32)

    loss = contrastive_loss(output1, output2, label, margin=1.0)
    jax.block_until_ready(loss)
    ref = _reference(output1, output2, label, margin=1.0)
    assert jnp.allclose(loss, ref, rtol=1e-5, atol=1e-5), (loss, ref)

    # bf16 inputs stream at native width (cast happens in-kernel).
    loss_bf16 = contrastive_loss(output1.astype(jnp.bfloat16),
                                 output2.astype(jnp.bfloat16), label, margin=1.0)
    jax.block_until_ready(loss_bf16)
    ref_bf16 = _reference(output1.astype(jnp.bfloat16),
                          output2.astype(jnp.bfloat16), label, margin=1.0)
    assert jnp.allclose(loss_bf16, ref_bf16, rtol=2e-2, atol=2e-2), (loss_bf16, ref_bf16)

    # Exercises the multi-tile "parallel" grid, the remainder mask, and the
    # chunked-D accumulation path (D=1536 -> d_chunk=768).
    B2, D2 = 260, 1536
    o1b = jax.random.normal(k4, (B2, D2), dtype=jnp.float32)
    o2b = jax.random.normal(k5, (B2, D2), dtype=jnp.float32)
    lblb = jax.random.bernoulli(k6, p=0.5, shape=(B2,)).astype(jnp.float32)
    loss2 = contrastive_loss(o1b, o2b, lblb, margin=1.0)
    jax.block_until_ready(loss2)
    ref2 = _reference(o1b, o2b, lblb, margin=1.0)
    assert jnp.allclose(loss2, ref2, rtol=1e-5, atol=1e-5), (loss2, ref2)

    print("KERNEL_OK")
</pallas_src>

<mosaic_0001>
module attributes {stable_mosaic.version = 11 : i64} {
  func.func @_contrastive_kernel(%arg0: i32, %arg1: memref<8x32xf32, #tpu.memory_space<vmem>>, %arg2: memref<8x32xf32, #tpu.memory_space<vmem>>, %arg3: memref<8x1xf32, #tpu.memory_space<vmem>>, %arg4: memref<1x1xf32, #tpu.memory_space<smem>>) attributes {dimension_semantics = [#tpu.dimension_semantics<parallel>], iteration_bounds = array<i64: 1>, scalar_prefetch = 0 : i64, scratch_operands = 0 : i64, tpu.core_type = #tpu.core_type<tc>, window_params = [{transform_indices = @transform_0, window_bounds = array<i64: 8, 32>}, {transform_indices = @transform_1, window_bounds = array<i64: 8, 32>}, {transform_indices = @transform_2, window_bounds = array<i64: 8, 1>}, {transform_indices = @transform_3, window_bounds = array<i64: 1, 1>}]} {
    %c0 = arith.constant 0 : index
    %c0_0 = arith.constant 0 : index
    %0 = vector.load %arg1[%c0, %c0_0] : memref<8x32xf32, #tpu.memory_space<vmem>>, vector<8x32xf32>
    %c0_1 = arith.constant 0 : index
    %c0_2 = arith.constant 0 : index
    %1 = vector.load %arg2[%c0_1, %c0_2] : memref<8x32xf32, #tpu.memory_space<vmem>>, vector<8x32xf32>
    %2 = arith.subf %0, %1 : vector<8x32xf32>
    %cst = arith.constant 9.99999997E-7 : f32
    %3 = vector.broadcast %cst : f32 to vector<8x32xf32>
    %4 = arith.addf %2, %3 : vector<8x32xf32>
    %5 = arith.mulf %4, %4 : vector<8x32xf32>
    %cst_3 = arith.constant dense<0.000000e+00> : vector<8xf32>
    %6 = vector.multi_reduction <add>, %5, %cst_3 [1] : vector<8x32xf32> to vector<8xf32>
    %7 = vector.shape_cast %6 : vector<8xf32> to vector<8x1xf32>
    %c0_4 = arith.constant 0 : index
    %c0_5 = arith.constant 0 : index
    %8 = vector.load %arg3[%c0_4, %c0_5] : memref<8x1xf32, #tpu.memory_space<vmem>>, vector<8x1xf32>
    %9 = math.sqrt %7 : vector<8x1xf32>
    %cst_6 = arith.constant 1.000000e+00 : f32
    %10 = vector.broadcast %cst_6 : f32 to vector<8x1xf32>
    %11 = arith.subf %10, %9 : vector<8x1xf32>
    %cst_7 = arith.constant 0.000000e+00 : f32
    %12 = vector.broadcast %cst_7 : f32 to vector<8x1xf32>
    %13 = arith.maximumf %11, %12 : vector<8x1xf32>
    %14 = arith.mulf %8, %7 : vector<8x1xf32>
    %cst_8 = arith.constant 1.000000e+00 : f32
    %15 = vector.broadcast %cst_8 : f32 to vector<8x1xf32>
    %16 = arith.subf %15, %8 : vector<8x1xf32>
    %17 = arith.mulf %16, %13 : vector<8x1xf32>
    %18 = arith.mulf %17, %13 : vector<8x1xf32>
    %19 = arith.addf %14, %18 : vector<8x1xf32>
    %20 = vector.shape_cast %19 : vector<8x1xf32> to vector<1x8x1xf32>
    %cst_9 = arith.constant dense<0.000000e+00> : vector<1xf32>
    %21 = vector.multi_reduction <add>, %20, %cst_9 [1, 2] : vector<1x8x1xf32> to vector<1xf32>
    %22 = vector.shape_cast %21 : vector<1xf32> to vector<1x1x1xf32>
    %23 = vector.extract %22[0, 0, 0] : f32 from vector<1x1x1xf32>
    %c0_10 = arith.constant 0 : index
    %c0_11 = arith.constant 0 : index
    %24 = memref.load %arg4[%c0_10, %c0_11] : memref<1x1xf32, #tpu.memory_space<smem>>
    memref.store %23, %arg4[%c0_10, %c0_11] : memref<1x1xf32, #tpu.memory_space<smem>>
    return
  }
  func.func @transform_0(%arg0: i32) -> (i32, i32) {
    %c0_i32 = arith.constant 0 : i32
    %c0_i32_0 = arith.constant 0 : i32
    return %arg0, %c0_i32 : i32, i32
  }
  func.func @transform_1(%arg0: i32) -> (i32, i32) {
    %c0_i32 = arith.constant 0 : i32
    %c0_i32_0 = arith.constant 0 : i32
    return %arg0, %c0_i32 : i32, i32
  }
  func.func @transform_2(%arg0: i32) -> (i32, i32) {
    %c0_i32 = arith.constant 0 : i32
    %c0_i32_0 = arith.constant 0 : i32
    return %arg0, %c0_i32 : i32, i32
  }
  func.func @transform_3(%arg0: i32) -> (i32, i32) {
    %c0_i32 = arith.constant 0 : i32
    %c0_i32_0 = arith.constant 0 : i32
    return %arg0, %c0_i32 : i32, i32
  }
}

</mosaic_0001>

<bundles_post_ra>
// kernel: tpu_custom_call.1
= control target key start
LH: loop header
LB: loop body
LE: loop exit
PB: predicated region body
PF: predicated region fallthrough
CT: control target
= control target key end

     0   :  { %8 = vsyncpa [#allocation3], 0  ;;  %s167_s0 = inlined_call_operand.vmem [shape: f32[8,32], index: 0, kind: input, shape index: {}]   ;;  %s168_s1 = inlined_call_operand.hbm [shape: f32[8,32], index: 1, kind: input, shape index: {}]   ;;  %s169_s2 = inlined_call_operand.vmem [shape: f32[8,1], index: 2, kind: input, shape index: {}]   ;;  %s170_s3 = inlined_call_operand.hbm [shape: f32[1,1], index: 3, kind: output, shape index: {}]  }
   0x1   :  { %9 = vsyncpa [#allocation4], 0  ;;  %s17_s14 = sshll.u32 %s168_s1, 4  ;;  %s133_s15 = smov [#allocation2]   ;;  %s18_s14 = int_to_ptr.hbm [resolvable:$true] %s17_s14 }
   0x2   :  { %s19_s16 = sshll.u32 %s133_s15, 4  ;;  %s20_s16 = int_to_ptr.vmem [resolvable:$true] %s19_s16 }
   0x3   :  { %22 = dma.hbm_to_vmem [thread:$0]  %s18_s14, 128, %s20_s16, [#allocation3]  }
   0x4   :  { %129 = dma.done.wait [#allocation3], 128  }
   0x5   :  { %130 = vsyncadd [#allocation3], 4294967168  ;;  %v29_v0 = vld [vmem:[%s167_s0] sm:$0xff]  ;;  %vm34_vm0 = vcmask 261120   ;;  %vm58_vm3 = vcmask 7168   ;;  %s76_s20 = sshll.u32 %s170_s3, 4  ;;  %s77_s20 = int_to_ptr.hbm [resolvable:$true] %s76_s20 }
   0x6   :  { %v30_v1 = vld [vmem:[#allocation2] sm:$0xff]  ;;  %s134_s22 = smov [#allocation5]  }
   0x7   :  { %v31_v2 = vsub.f32 %v29_v0, %v30_v1  ;;  %v38_v16 = vld [vmem:[%s169_s2] sm:$0xff] }
   0x8   :  { %v54_v19 = vsub.f32 1.0, %v38_v16 }
   0x9   :  { %v32_v3 = vadd.f32 1e-06, %v31_v2 }
   0xb   :  { %v33_v4 = vmul.f32 %v32_v3, %v32_v3 }
   0xd   :  { %v35_v5 = vsel %vm34_vm0, %v33_v4, 0.0 }
   0xe   :  { %36 = vadd.xlane.f32.xlu0 %v35_v5 }
  0x81   :  { %v37_v6 = vpop.xlane.xlu0 %36 }
  0x82   :  { %91 = vrsqrt.f32 %v37_v6  ;;  %vm46_vm1 = vcmp.eq.f32.partialorder %v37_v6, inf  ;;  %v49_v14 = vand.u32 2147483648, %v37_v6  ;;  %vm48_vm2 = vcmp.eq.f32.partialorder %v37_v6, 0.0 }
  0x83   :  { %v53_v22 = vmul.f32 %v38_v16, %v37_v6 }
  0x88   :  { %v92_v7 = vpop.eup %91 }
  0x89   :  { %v40_v8 = vmul.f32 %v92_v7, %v37_v6 }
  0x8b   :  { %v41_v9 = vmul.f32 %v92_v7, %v40_v8 }
  0x8d   :  { %v42_v10 = vmul.f32 0.5, %v41_v9 }
  0x8f   :  { %v43_v11 = vsub.f32 1.5, %v42_v10 }
  0x91   :  { %v44_v12 = vmul.f32 %v92_v7, %v43_v11 }
  0x93   :  { %v45_v13 = vmul.f32 %v44_v12, %v37_v6 }
  0x95   :  { %v47_v15 = vsel %vm46_vm1, %v37_v6, %v45_v13 }
  0x96   :  { %v50_v17 = vsel %vm48_vm2, %v49_v14, %v47_v15 }
  0x97   :  { %v51_v18 = vsub.f32 1.0, %v50_v17 }
  0x99   :  { %v52_v20 = vmax.f32 %v51_v18, 0.0 }
  0x9b   :  { %v55_v21 = vmul.f32 %v54_v19, %v52_v20 }
  0x9d   :  { %v56_v23 = vmul.f32 %v55_v21, %v52_v20 }
  0x9f   :  { %v57_v24 = vadd.f32 %v56_v23, %v53_v22 }
  0xa1   :  { %v59_v25 = vsel %vm58_vm3, %v57_v24, 0.0 }
  0xa2   :  { %60 = vadd.xlane.f32.xlu0 %v59_v25 }
 0x115   :  { %v61_v26 = vpop.xlane.xlu0 %60 }
 0x116   :  { %v62_v27 = vrot.slane %v61_v26, 4 }
 0x118   :  { %v63_v28 = vadd.f32 %v62_v27, %v61_v26 }
 0x11a   :  { %v64_v29 = vrot.slane %v63_v28, 2 }
 0x11c   :  { %v65_v30 = vadd.f32 %v64_v29, %v63_v28 }
 0x11e   :  { %v66_v31 = vrot.slane %v65_v30, 1 }
 0x120   :  { %v67_v32 = vadd.f32 %v66_v31, %v65_v30 }
 0x122   :  { %87 = vpush %v67_v32 }
 0x153   :  { %s88_s21 = spop %87 }
 0x154   :  { %70 = sst [smem:[#allocation5]] %s88_s21 }
 0x155   :  { %79 = dma.smem_to_hbm %s134_s22, 16, %s77_s20, [#allocation4]  }
 0x156   :  { %131 = dma.done.wait [#allocation4], 16  }
 0x157   :  { %132 = vsyncadd [#allocation4], 4294967280 }
 0x158   :  { %84 = sfence }
 0x159   :  { %85 = vsyncpa [#allocation3], 1 }
 0x15a   :  { %86 = vsyncpa [#allocation4], 1 }

</bundles_post_ra>
